<compile_context>
chip_gen: v7x
topology: tpu7x:2x2x1
jax: 0.10.0
libtpu: 0.0.40
codegen_flags: <defaults>
</compile_context>

<pallas_src>
import functools

import jax
import jax.numpy as jnp
from jax import lax
from jax.experimental import pallas as pl
from jax.experimental.pallas import tpu as pltpu

_SUBLANE = 8
_LANE = 128


def _cdiv(a, b):
    return -(-a // b)


def _round_up(x, m):
    return ((x + m - 1) // m) * m


def _pick_chunk_rows(block_rows, sub_mult, target=128):
    """Largest divisor of block_rows that is a multiple of sub_mult and <= target."""
    best = sub_mult
    c = sub_mult
    while c <= min(target, block_rows):
        if block_rows % c == 0:
            best = c
        c += sub_mult
    return best


def _bare_loss_kernel(x_ref, o_ref, *, total_rows, block_rows, chunk_rows,
                      inner_blocks, num_outer, needs_mask):
    """Sum one [block_rows, 128] tile into the resident (1, 8, 128) output block.

    Grid is (num_outer, inner_blocks): the outer axis is 'parallel' (megacore
    split on v7x), the inner axis is the sequential reduction.  The output
    block index depends only on the outer axis, so o_ref stays resident in
    VMEM across the whole reduction and doubles as the accumulator.
    """
    c = pl.program_id(0)           # parallel (per-core) axis
    i = pl.program_id(1)           # sequential reduction axis

    @pl.when(i == 0)
    def _init():
        o_ref[...] = jnp.zeros_like(o_ref)

    block_start = (c * inner_blocks + i) * block_rows
    n_chunks = block_rows // chunk_rows
    unroll = max(1, min(4, n_chunks))

    def _block_sum(masked):
        def chunk_add(k, acc):
            r0 = pl.multiple_of(k * chunk_rows, chunk_rows)
            x = x_ref[pl.ds(r0, chunk_rows), :].astype(jnp.float32)
            if masked:
                row = (lax.broadcasted_iota(jnp.int32, x.shape, 0)
                       + block_start + r0)
                x = jnp.where(row < total_rows, x, 0.0)
            # VPU-only partial reduction: fold chunk into a single (8,128) vreg.
            return acc + x.reshape(-1, _SUBLANE, _LANE).sum(axis=0)

        return lax.fori_loop(0, n_chunks, chunk_add,
                             jnp.zeros((_SUBLANE, _LANE), jnp.float32),
                             unroll=unroll)

    if needs_mask:
        # Only the global last block can contain padded (garbage) rows.
        is_last = jnp.logical_and(c == num_outer - 1, i == inner_blocks - 1)

        @pl.when(is_last)
        def _masked():
            o_ref[...] += _block_sum(True)[None]

        @pl.when(jnp.logical_not(is_last))
        def _unmasked():
            o_ref[...] += _block_sum(False)[None]
    else:
        o_ref[...] += _block_sum(False)[None]


def bare_loss(pre_loss, loss_weight=1.0, *, block_bytes=6 << 20,
              fastpath_elems=1 << 14):
    """JAX/Pallas equivalent of BareLoss.forward: loss_weight * pre_loss.mean()."""
    n = pre_loss.size
    orig_dtype = pre_loss.dtype

    if n == 0:
        # torch: mean of an empty tensor is nan.
        return jnp.asarray(jnp.nan, dtype=orig_dtype)

    if n <= fastpath_elems:
        # Tiny loss maps: a single fused XLA mean beats pallas_call overhead.
        loss = jnp.mean(pre_loss.astype(jnp.float32)) * loss_weight
        return loss.astype(orig_dtype)

    x_flat = pre_loss.reshape(-1)                      # free, keeps native dtype
    itemsize = jnp.dtype(orig_dtype).itemsize
    sub_mult = _SUBLANE * max(1, 4 // itemsize)        # f32:8, bf16/f16:16, 8-bit:32

    # Lane-aligned main slab + ragged (<128 element) tail in the wrapper.
    n_main = (n // _LANE) * _LANE
    rows = n_main // _LANE
    if n_main < n:
        # TODO(synk): for large ragged inputs XLA may materialize this prefix
        # slice as a full copy (extra HBM traffic); aligned inputs are copy-free.
        tail_sum = jnp.sum(x_flat[n_main:].astype(jnp.float32))
        x_main = x_flat[:n_main]
    else:
        tail_sum = jnp.float32(0.0)
        x_main = x_flat

    if rows == 0:
        loss = tail_sum * (loss_weight / n)
        return loss.astype(orig_dtype)

    x2d = x_main.reshape(rows, _LANE)                  # free view when no tail

    # --- block sizing: ~block_bytes of input per block, even block count ----
    row_bytes = _LANE * itemsize
    blocks_target = max(1, _cdiv(rows * row_bytes, block_bytes))
    if blocks_target >= 2 and blocks_target % 2:
        blocks_target += 1                             # prefer even (v7x 2-TC split)
    block_rows = _round_up(_cdiv(rows, blocks_target), sub_mult)
    block_rows = min(block_rows, _round_up(rows, sub_mult))
    chunk_rows = _pick_chunk_rows(block_rows, sub_mult, target=128)

    nb = _cdiv(rows, block_rows)
    num_outer = 2 if (nb >= 2 and nb % 2 == 0) else 1
    inner_blocks = nb // num_outer
    needs_mask = (nb * block_rows != rows)

    partials = pl.pallas_call(
        functools.partial(
            _bare_loss_kernel,
            total_rows=rows, block_rows=block_rows, chunk_rows=chunk_rows,
            inner_blocks=inner_blocks, num_outer=num_outer,
            needs_mask=needs_mask),
        out_shape=jax.ShapeDtypeStruct((num_outer, _SUBLANE, _LANE), jnp.float32),
        grid=(num_outer, inner_blocks),
        in_specs=[pl.BlockSpec((block_rows, _LANE),
                               lambda c, i: (c * inner_blocks + i, 0))],
        out_specs=pl.BlockSpec((1, _SUBLANE, _LANE), lambda c, i: (c, 0, 0)),
        # TODO(synk): verify on v7x that "parallel" actually shards the outer axis
        # across the two TensorCores; if not, switch to pltpu.CORE_PARALLEL.
        compiler_params=pltpu.CompilerParams(
            dimension_semantics=("parallel", "arbitrary")),
    )(x2d)

    # Final tiny reduce + scaling in the wrapper (no recompile per loss_weight).
    loss = (jnp.sum(partials) + tail_sum) * (loss_weight / n)
    return loss.astype(orig_dtype)


if __name__ == "__main__":
    key = jax.random.PRNGKey(0)
    k1, k2, k3, k4, k5 = jax.random.split(key, 5)
    lw = 2.5

    # 1) f32, lane-divisible, above the fast-path threshold: single-block kernel.
    x1 = jax.random.normal(k1, (2, 4, 64, 64), dtype=jnp.float32)
    out1 = jax.block_until_ready(bare_loss(x1, loss_weight=lw))
    ref1 = lw * jnp.mean(x1)
    assert jnp.allclose(out1, ref1, atol=1e-6, rtol=1e-5), (out1, ref1)

    # 2) Forced multi-block + 2-way parallel split + masked partial last block.
    x2 = jax.random.normal(k2, (2, 4, 20, 32), dtype=jnp.float32)
    out2 = jax.block_until_ready(
        bare_loss(x2, loss_weight=0.5, block_bytes=16384, fastpath_elems=0))
    ref2 = 0.5 * jnp.mean(x2)
    assert jnp.allclose(out2, ref2, atol=1e-6, rtol=1e-5), (out2, ref2)

    # 3) bf16 input: in-kernel upcast, multi-block reduction, row masking.
    x3 = jax.random.normal(k3, (2, 4, 24, 24), dtype=jnp.bfloat16)
    out3 = jax.block_until_ready(
        bare_loss(x3, loss_weight=lw, block_bytes=4096, fastpath_elems=0))
    ref3 = lw * jnp.mean(x3.astype(jnp.float32))
    assert jnp.allclose(out3.astype(jnp.float32), ref3,
                        atol=1e-3, rtol=2e-2), (out3, ref3)

    # 4) Ragged size (not a multiple of 128): kernel prefix + wrapper tail sum.
    x4 = jax.random.normal(k4, (3, 5, 7, 11), dtype=jnp.float32)
    out4 = jax.block_until_ready(bare_loss(x4, fastpath_elems=0))
    ref4 = jnp.mean(x4)
    assert jnp.allclose(out4, ref4, atol=1e-6, rtol=1e-5), (out4, ref4)

    # 5) Tiny input: pure-XLA fast path (no pallas_call).
    x5 = jax.random.normal(k5, (2, 4, 16, 16), dtype=jnp.float32)
    out5 = jax.block_until_ready(bare_loss(x5, loss_weight=lw))
    ref5 = lw * jnp.mean(x5)
    assert jnp.allclose(out5, ref5, atol=1e-6, rtol=1e-5), (out5, ref5)

    print("KERNEL_OK")
</pallas_src>

<mosaic_0001>
module attributes {stable_mosaic.version = 11 : i64} {
  func.func @_bare_loss_kernel(%arg0: i32, %arg1: i32, %arg2: memref<256x128xf32, #tpu.memory_space<vmem>>, %arg3: memref<1x8x128xf32, #tpu.memory_space<vmem>>) attributes {dimension_semantics = [#tpu.dimension_semantics<parallel>, #tpu.dimension_semantics<arbitrary>], iteration_bounds = array<i64: 1, 1>, scalar_prefetch = 0 : i64, scratch_operands = 0 : i64, tpu.core_type = #tpu.core_type<tc>, window_params = [{transform_indices = @transform_0, window_bounds = array<i64: 256, 128>}, {transform_indices = @transform_1, window_bounds = array<i64: 1, 8, 128>}]} {
    %c0_i32 = arith.constant 0 : i32
    %0 = arith.cmpi eq, %arg1, %c0_i32 : i32
    %1 = arith.extui %0 : i1 to i32
    %c0_i32_0 = arith.constant 0 : i32
    %2 = arith.cmpi ne, %1, %c0_i32_0 : i32
    scf.if %2 {
      %cst_12 = arith.constant 0.000000e+00 : f32
      %22 = vector.broadcast %cst_12 : f32 to vector<1x8x128xf32>
      %c0_13 = arith.constant 0 : index
      %c0_14 = arith.constant 0 : index
      %c0_15 = arith.constant 0 : index
      %23 = vector.load %arg3[%c0_13, %c0_14, %c0_15] : memref<1x8x128xf32, #tpu.memory_space<vmem>>, vector<1x8x128xf32>
      tpu.vector_store %arg3[%c0_13, %c0_14, %c0_15], %22 {strides = array<i32>} : memref<1x8x128xf32, #tpu.memory_space<vmem>>, vector<1x8x128xf32>,
    } else {
    }
    %c0 = arith.constant 0 : index
    %c0_1 = arith.constant 0 : index
    %c0_2 = arith.constant 0 : index
    %3 = vector.load %arg3[%c0, %c0_1, %c0_2] : memref<1x8x128xf32, #tpu.memory_space<vmem>>, vector<1x8x128xf32>
    %cst = arith.constant 0.000000e+00 : f32
    %4 = vector.broadcast %cst : f32 to vector<8x128xf32>
    %c0_i32_3 = arith.constant 0 : i32
    %c128_i32 = arith.constant 128 : i32
    %5 = arith.muli %c0_i32_3, %c128_i32 : i32
    %6 = tpu.assume_multiple %5, 128 : i32
    %7 = arith.index_cast %6 : i32 to index
    %c0_4 = arith.constant 0 : index
    %8 = vector.load %arg2[%7, %c0_4] : memref<256x128xf32, #tpu.memory_space<vmem>>, vector<128x128xf32>
    %9 = vector.shape_cast %8 : vector<128x128xf32> to vector<16x8x128xf32>
    %cst_5 = arith.constant dense<0.000000e+00> : vector<8x128xf32>
    %10 = vector.multi_reduction <add>, %9, %cst_5 [0] : vector<16x8x128xf32> to vector<8x128xf32>
    %11 = arith.addf %4, %10 : vector<8x128xf32>
    %c1_i32 = arith.constant 1 : i32
    %c128_i32_6 = arith.constant 128 : i32
    %12 = arith.muli %c1_i32, %c128_i32_6 : i32
    %13 = tpu.assume_multiple %12, 128 : i32
    %14 = arith.index_cast %13 : i32 to index
    %c0_7 = arith.constant 0 : index
    %15 = vector.load %arg2[%14, %c0_7] : memref<256x128xf32, #tpu.memory_space<vmem>>, vector<128x128xf32>
    %16 = vector.shape_cast %15 : vector<128x128xf32> to vector<16x8x128xf32>
    %cst_8 = arith.constant dense<0.000000e+00> : vector<8x128xf32>
    %17 = vector.multi_reduction <add>, %16, %cst_8 [0] : vector<16x8x128xf32> to vector<8x128xf32>
    %18 = arith.addf %11, %17 : vector<8x128xf32>
    %c2_i32 = arith.constant 2 : i32
    %19 = vector.shape_cast %18 : vector<8x128xf32> to vector<1x8x128xf32>
    %20 = arith.addf %3, %19 : vector<1x8x128xf32>
    %c0_9 = arith.constant 0 : index
    %c0_10 = arith.constant 0 : index
    %c0_11 = arith.constant 0 : index
    %21 = vector.load %arg3[%c0_9, %c0_10, %c0_11] : memref<1x8x128xf32, #tpu.memory_space<vmem>>, vector<1x8x128xf32>
    tpu.vector_store %arg3[%c0_9, %c0_10, %c0_11], %20 {strides = array<i32>} : memref<1x8x128xf32, #tpu.memory_space<vmem>>, vector<1x8x128xf32>,
    return
  }
  func.func @transform_0(%arg0: i32, %arg1: i32) -> (i32, i32) {
    %c1_i32 = arith.constant 1 : i32
    %0 = arith.muli %arg0, %c1_i32 : i32
    %1 = arith.addi %0, %arg1 : i32
    %c0_i32 = arith.constant 0 : i32
    %c0_i32_0 = arith.constant 0 : i32
    return %1, %c0_i32 : i32, i32
  }
  func.func @transform_1(%arg0: i32, %arg1: i32) -> (i32, i32, i32) {
    %c0_i32 = arith.constant 0 : i32
    %c0_i32_0 = arith.constant 0 : i32
    %c0_i32_1 = arith.constant 0 : i32
    return %arg0, %c0_i32, %c0_i32_0 : i32, i32, i32
  }
}

</mosaic_0001>

<bundles_post_ra>
// kernel: tpu_custom_call.1
= control target key start
LH: loop header
LB: loop body
LE: loop exit
PB: predicated region body
PF: predicated region fallthrough
CT: control target
= control target key end

     0   :  { %6 = vsyncpa [#allocation3], 0  ;;  %s208_s0 = inlined_call_operand.hbm [shape: f32[256,128], index: 0, kind: input, shape index: {}]   ;;  %s209_s1 = inlined_call_operand.hbm [shape: f32[1,8,128], index: 1, kind: output, shape index: {}]  }
   0x1   :  { %7 = vsyncpa [#allocation4], 0  ;;  %s170_s6 = smov [#allocation2]   ;;  %s122_s10 = scalar_lea.hbm %s208_s0, 4096 }
   0x2   :  { %s17_s7 = sshll.u32 %s170_s6, 4  ;;  %p123_p0 = scmp.ne.s32.totalorder %s208_s0, %s122_s10  ;;  %s18_s7 = int_to_ptr.vmem [resolvable:$true] %s17_s7 }
   0x3   :  { %p126_p1 = scmp.lt.u32.totalorder %s122_s10, %s208_s0 }
   0x5   :  { %p128_p2 = pnand %p126_p1, %p123_p0 }
   0x7   :  { %131 = shalt.err (!%p128_p2)
}
   0x8   :  { %s132_s15 = scalar_lea.vmem %s18_s7, 4096  ;;  %p137_p4 = scmp.lt.s32.totalorder %s18_s7, %s18_s7 }
   0x9   :  { %p133_p3 = scmp.ne.s32.totalorder %s18_s7, %s132_s15  ;;  %p138_p5 = scmp.lt.s32.totalorder %s132_s15, %s132_s15 }
   0xb   :  { %p139_p6 = por %p138_p5, %p137_p4 }
   0xd   :  { %p140_p7 = pnand %p139_p6, %p133_p3 }
   0xf   :  { %143 = shalt.err (!%p140_p7)
}
  0x10   :  { %s171_s16 = smov 128   ;;  %s172_s17 = smov 8  }
  0x11   :  { %23 = dma.hbm_to_vmem [thread:$0]  %s208_s0, 4096, %s18_s7, [#allocation3], %s171_s16, %s171_s16, %s172_s17  }
  0x12   :  { %166 = dma.done.wait [#allocation3], 4096  }
  0x13   :  { %167 = vsyncadd [#allocation3], 4294963200  ;;  %v35_v0 = vld [vmem:[#allocation2] sm:$0xff]  ;;  %v36_v1 = vld [vmem:[#allocation2 + $0x8] sm:$0xff]  ;;  %s173_s0 = smov [#allocation5]  }
  0x14   :  { %v37_v2 = vld [vmem:[#allocation2 + $0x10] sm:$0xff]  ;;  %v51_v3 = vadd.f32 %v36_v1, %v35_v0  ;;  %v38_v4 = vld [vmem:[#allocation2 + $0x18] sm:$0xff]  ;;  %v39_v6 = vld [vmem:[#allocation2 + $0x20] sm:$0xff]  ;;  %s108_s20 = sshll.u32 %s173_s0, 4  ;;  %s109_s20 = int_to_ptr.vmem [resolvable:$true] %s108_s20 }
  0x15   :  { %v68_v8 = vld [vmem:[#allocation2 + $0x80] sm:$0xff]  ;;  %v69_v9 = vld [vmem:[#allocation2 + $0x88] sm:$0xff]  ;;  %v70_v11 = vld [vmem:[#allocation2 + $0x90] sm:$0xff]  ;;  %s144_s21 = scalar_lea.vmem %s109_s20, 128  ;;  %p149_p9 = scmp.lt.s32.totalorder %s109_s20, %s109_s20 }
  0x16   :  { %v52_v5 = vadd.f32 %v51_v3, %v37_v2  ;;  %v40_v10 = vld [vmem:[#allocation2 + $0x28] sm:$0xff]  ;;  %v84_v12 = vadd.f32 %v69_v9, %v68_v8  ;;  %v71_v14 = vld [vmem:[#allocation2 + $0x98] sm:$0xff]  ;;  %v41_v15 = vld [vmem:[#allocation2 + $0x30] sm:$0xff]  ;;  %p145_p8 = scmp.ne.s32.totalorder %s109_s20, %s144_s21  ;;  %p150_p10 = scmp.lt.s32.totalorder %s144_s21, %s144_s21 }
  0x17   :  { %v72_v18 = vld [vmem:[#allocation2 + $0xa0] sm:$0xff]  ;;  %v42_v19 = vld [vmem:[#allocation2 + $0x38] sm:$0xff]  ;;  %v73_v22 = vld [vmem:[#allocation2 + $0xa8] sm:$0xff] }
  0x18   :  { %v53_v7 = vadd.f32 %v52_v5, %v38_v4  ;;  %v85_v16 = vadd.f32 %v84_v12, %v70_v11  ;;  %v43_v23 = vld [vmem:[#allocation2 + $0x40] sm:$0xff]  ;;  %v74_v26 = vld [vmem:[#allocation2 + $0xb0] sm:$0xff]  ;;  %v44_v27 = vld [vmem:[#allocation2 + $0x48] sm:$0xff]  ;;  %p151_p11 = por %p150_p10, %p149_p9 }
  0x19   :  { %v75_v30 = vld [vmem:[#allocation2 + $0xb8] sm:$0xff]  ;;  %v45_v31 = vld [vmem:[#allocation2 + $0x50] sm:$0xff]  ;;  %v76_v34 = vld [vmem:[#allocation2 + $0xc0] sm:$0xff] }
  0x1a   :  { %v54_v13 = vadd.f32 %v53_v7, %v39_v6  ;;  %v86_v20 = vadd.f32 %v85_v16, %v71_v14  ;;  %v46_v35 = vld [vmem:[#allocation2 + $0x58] sm:$0xff]  ;;  %v77_v38 = vld [vmem:[#allocation2 + $0xc8] sm:$0xff]  ;;  %v47_v39 = vld [vmem:[#allocation2 + $0x60] sm:$0xff]  ;;  %p152_p12 = pnand %p151_p11, %p145_p8 }
  0x1b   :  { %v78_v42 = vld [vmem:[#allocation2 + $0xd0] sm:$0xff]  ;;  %v48_v43 = vld [vmem:[#allocation2 + $0x68] sm:$0xff]  ;;  %v79_v46 = vld [vmem:[#allocation2 + $0xd8] sm:$0xff] }
  0x1c   :  { %v55_v17 = vadd.f32 %v54_v13, %v40_v10  ;;  %v87_v24 = vadd.f32 %v86_v20, %v72_v18  ;;  %v49_v48 = vld [vmem:[#allocation2 + $0x70] sm:$0xff]  ;;  %v80_v50 = vld [vmem:[#allocation2 + $0xe0] sm:$0xff]  ;;  %v81_v52 = vld [vmem:[#allocation2 + $0xe8] sm:$0xff] }
  0x1d   :  { %v50_v55 = vld [vmem:[#allocation2 + $0x78] sm:$0xff]  ;;  %v82_v56 = vld [vmem:[#allocation2 + $0xf0] sm:$0xff] }
  0x1e   :  { %v56_v21 = vadd.f32 %v55_v17, %v41_v15  ;;  %v88_v28 = vadd.f32 %v87_v24, %v73_v22  ;;  %v83_v58 = vld [vmem:[#allocation2 + $0xf8] sm:$0xff] }
  0x20   :  { %v57_v25 = vadd.f32 %v56_v21, %v42_v19  ;;  %v89_v32 = vadd.f32 %v88_v28, %v74_v26 }
  0x22   :  { %v58_v29 = vadd.f32 %v57_v25, %v43_v23  ;;  %v90_v36 = vadd.f32 %v89_v32, %v75_v30 }
  0x24   :  { %v59_v33 = vadd.f32 %v58_v29, %v44_v27  ;;  %v91_v40 = vadd.f32 %v90_v36, %v76_v34 }
  0x26   :  { %v60_v37 = vadd.f32 %v59_v33, %v45_v31  ;;  %v92_v44 = vadd.f32 %v91_v40, %v77_v38 }
  0x28   :  { %v61_v41 = vadd.f32 %v60_v37, %v46_v35  ;;  %v93_v47 = vadd.f32 %v92_v44, %v78_v42 }
  0x2a   :  { %v62_v45 = vadd.f32 %v61_v41, %v47_v39  ;;  %v94_v51 = vadd.f32 %v93_v47, %v79_v46 }
  0x2c   :  { %v63_v49 = vadd.f32 %v62_v45, %v48_v43  ;;  %v95_v54 = vadd.f32 %v94_v51, %v80_v50 }
  0x2e   :  { %v64_v53 = vadd.f32 %v63_v49, %v49_v48  ;;  %v96_v57 = vadd.f32 %v95_v54, %v81_v52 }
  0x30   :  { %v65_v59 = vadd.f32 %v64_v53, %v50_v55  ;;  %v97_v60 = vadd.f32 %v96_v57, %v82_v56 }
  0x32   :  { %v98_v61 = vadd.f32 %v97_v60, %v83_v58 }
  0x34   :  { %v99_v62 = vadd.f32 %v98_v61, %v65_v59 }
  0x36   :  { %101 = vst [vmem:[#allocation5] sm:$0xff] %v99_v62 }
  0x37   :  { %155 = shalt.err (!%p152_p12)
}
  0x38   :  { %s156_s24 = scalar_lea.hbm %s209_s1, 128 }
  0x39   :  { %p157_p13 = scmp.ne.s32.totalorder %s209_s1, %s156_s24  ;;  %p160_p0 = scmp.lt.u32.totalorder %s156_s24, %s209_s1 }
  0x3b   :  { %p162_p1 = pnand %p160_p0, %p157_p13 }
  0x3d   :  { %165 = shalt.err (!%p162_p1)
}
  0x3e   :  { %111 = dma.vmem_to_hbm [thread:$0]  %s109_s20, 128, %s209_s1, [#allocation4]  }
  0x3f   :  { %168 = dma.done.wait [#allocation4], 128  }
  0x40   :  { %169 = vsyncadd [#allocation4], 4294967168 }
  0x41   :  { %115 = vsyncpa [#allocation3], 1 }
  0x42   :  { %116 = vsyncpa [#allocation4], 1 }

</bundles_post_ra>
